<compile_context>
chip_gen: v7x
topology: tpu7x:2x2x1
jax: 0.10.0
libtpu: 0.0.40
codegen_flags: <defaults>
</compile_context>

<pallas_src>
import jax
import jax.numpy as jnp
from jax.experimental import pallas as pl
from jax.experimental.pallas import tpu as pltpu

LANES = 128
SUBLANES = 8
# Slabs at or below this row count (<= 256 KiB f32) are processed as one
# block: a single DMA in + vmax + DMA out beats pipeline bookkeeping there.
SINGLE_BLOCK_MAX_ROWS = 512
# Upper bound on tile height for big slabs: 4096 x 128 f32 = 2 MiB / buffer.
# With default double-buffering on both input and output that is ~8 MiB of
# VMEM -> fits every generation's scoped default (16 MiB v5e, 32 MiB v6e/v7x),
# and a 2 MiB block per step sits at the ~86% point of the measured HBM
# roofline for f32 elementwise ops.
MAX_TILE_ROWS = 4096


def _relu_kernel(x_ref, o_ref):
    # Single vmax against a typed zero splat (no materialized zero tile, and
    # no dtype-promotion surprises if a non-float dtype ever shows up).
    o_ref[...] = jnp.maximum(x_ref[...], jnp.zeros((), x_ref.dtype))


def _pick_block_rows(rows):
    """Pick the block height for a [rows, 128] slab."""
    if rows <= SINGLE_BLOCK_MAX_ROWS:
        # Block shape == full array dims -> (8,128) rule trivially satisfied,
        # single grid step for tiny shapes only.
        return rows
    # Mid/large slabs: always give the grid >= 2 steps so (a) read and write
    # DMA traffic overlaps through the pipeline and (b) the "parallel" axis
    # actually shards across both TensorCores on v7x, while keeping each
    # block as large as possible (up to 2 MiB) to amortize per-step overhead.
    block = min(MAX_TILE_ROWS, pl.cdiv(rows, 2))
    # Non-full blocks must have a sublane-aligned height (multiple of 8);
    # Pallas masks the (possibly partial) last block automatically.
    return ((block + SUBLANES - 1) // SUBLANES) * SUBLANES


def relu_pallas(x):
    """ReLU(x) (inplace-style) for an NCHW tensor via a Pallas TPU kernel.

    Note: true in-place HBM reuse additionally requires the caller to donate
    the input at the jit boundary (jax.jit(..., donate_argnums=0)); without
    donation XLA inserts a copy and input_output_aliases is only a hint.
    """
    orig_shape = x.shape
    orig_dtype = x.dtype
    n_elem = x.size

    flat = x.reshape(-1)
    tail = n_elem % LANES
    if tail:
        # Fallback only: not taken for this module's shapes (element count is
        # a multiple of 128), so the main path does zero extra HBM traffic.
        flat = jnp.pad(flat, (0, LANES - tail))

    rows = flat.size // LANES
    slab = flat.reshape(rows, LANES)

    block_rows = _pick_block_rows(rows)
    grid = (pl.cdiv(rows, block_rows),)

    out = pl.pallas_call(
        _relu_kernel,
        out_shape=jax.ShapeDtypeStruct((rows, LANES), orig_dtype),
        grid=grid,
        in_specs=[pl.BlockSpec((block_rows, LANES), lambda i: (i, 0))],
        out_specs=pl.BlockSpec((block_rows, LANES), lambda i: (i, 0)),
        input_output_aliases={0: 0},  # matches ReLU(inplace=True) semantics
        compiler_params=pltpu.CompilerParams(
            dimension_semantics=("parallel",),
        ),
    )(slab)

    out_flat = out.reshape(-1)
    if tail:
        out_flat = out_flat[:n_elem]
    return out_flat.reshape(orig_shape)


if __name__ == "__main__":
    # Module M has no parameters — it is only ReLU(inplace=True).
    key = jax.random.PRNGKey(0)
    k0, k1 = jax.random.split(key)

    # Small shape consistent with the forward (exercises the single-block path).
    x_small = jax.random.normal(k0, (2, 4, 16, 16), dtype=jnp.float32)
    y_small = relu_pallas(x_small)
    jax.block_until_ready(y_small)
    assert y_small.shape == x_small.shape and y_small.dtype == x_small.dtype
    assert bool(jnp.all(y_small == jnp.maximum(x_small, 0.0)))

    # The module's own shape [1, 104, 56, 56] (exercises the >=2-step
    # pipelined path: 2548 rows -> two ~640 KiB blocks).
    x_mod = jax.random.normal(k1, (1, 104, 56, 56), dtype=jnp.float32)
    y_mod = relu_pallas(x_mod)
    jax.block_until_ready(y_mod)
    assert y_mod.shape == x_mod.shape and y_mod.dtype == x_mod.dtype
    assert bool(jnp.all(y_mod == jnp.maximum(x_mod, 0.0)))

    print("KERNEL_OK")
</pallas_src>

<mosaic_0001>
module attributes {stable_mosaic.version = 11 : i64} {
  func.func @_relu_kernel(%arg0: i32, %arg1: memref<16x128xf32, #tpu.memory_space<vmem>>, %arg2: memref<16x128xf32, #tpu.memory_space<vmem>>) attributes {dimension_semantics = [#tpu.dimension_semantics<parallel>], iteration_bounds = array<i64: 1>, scalar_prefetch = 0 : i64, scratch_operands = 0 : i64, tpu.core_type = #tpu.core_type<tc>, window_params = [{transform_indices = @transform_0, window_bounds = array<i64: 16, 128>}, {transform_indices = @transform_1, window_bounds = array<i64: 16, 128>}]} {
    %c0 = arith.constant 0 : index
    %c0_0 = arith.constant 0 : index
    %0 = vector.load %arg1[%c0, %c0_0] : memref<16x128xf32, #tpu.memory_space<vmem>>, vector<16x128xf32>
    %cst = arith.constant 0.000000e+00 : f32
    %1 = vector.broadcast %cst : f32 to vector<16x128xf32>
    %2 = arith.maximumf %0, %1 : vector<16x128xf32>
    %c0_1 = arith.constant 0 : index
    %c0_2 = arith.constant 0 : index
    %3 = vector.load %arg2[%c0_1, %c0_2] : memref<16x128xf32, #tpu.memory_space<vmem>>, vector<16x128xf32>
    tpu.vector_store %arg2[%c0_1, %c0_2], %2 {strides = array<i32>} : memref<16x128xf32, #tpu.memory_space<vmem>>, vector<16x128xf32>,
    return
  }
  func.func @transform_0(%arg0: i32) -> (i32, i32) {
    %c0_i32 = arith.constant 0 : i32
    %c0_i32_0 = arith.constant 0 : i32
    return %arg0, %c0_i32 : i32, i32
  }
  func.func @transform_1(%arg0: i32) -> (i32, i32) {
    %c0_i32 = arith.constant 0 : i32
    %c0_i32_0 = arith.constant 0 : i32
    return %arg0, %c0_i32 : i32, i32
  }
}

</mosaic_0001>

<bundles_post_ra>
// kernel: tpu_custom_call.1
= control target key start
LH: loop header
LB: loop body
LE: loop exit
PB: predicated region body
PF: predicated region fallthrough
CT: control target
= control target key end

     0   :  { %6 = vsyncpa [#allocation3], 0  ;;  %s136_s0 = inlined_call_operand.hbm [shape: f32[16,128], index: 0, kind: input, shape index: {}, may-alias: {0,1}]   ;;  %s137_s1 = inlined_call_operand.hbm [shape: f32[16,128], index: 1, kind: output, shape index: {}, may-alias: {0,1}]  }
   0x1   :  { %7 = vsyncpa [#allocation4], 0  ;;  %s98_s6 = smov [#allocation2]   ;;  %s50_s10 = scalar_lea.hbm %s136_s0, 256 }
   0x2   :  { %s13_s7 = sshll.u32 %s98_s6, 4  ;;  %p51_p0 = scmp.ne.s32.totalorder %s136_s0, %s50_s10  ;;  %s14_s7 = int_to_ptr.vmem [resolvable:$true] %s13_s7 }
   0x3   :  { %p54_p1 = scmp.lt.u32.totalorder %s50_s10, %s136_s0 }
   0x5   :  { %p56_p2 = pnand %p54_p1, %p51_p0 }
   0x7   :  { %59 = shalt.err (!%p56_p2)
}
   0x8   :  { %s60_s15 = scalar_lea.vmem %s14_s7, 256  ;;  %p65_p4 = scmp.lt.s32.totalorder %s14_s7, %s14_s7 }
   0x9   :  { %p61_p3 = scmp.ne.s32.totalorder %s14_s7, %s60_s15  ;;  %p66_p5 = scmp.lt.s32.totalorder %s60_s15, %s60_s15 }
   0xb   :  { %p67_p6 = por %p66_p5, %p65_p4 }
   0xd   :  { %p68_p7 = pnand %p67_p6, %p61_p3 }
   0xf   :  { %71 = shalt.err (!%p68_p7)
}
  0x10   :  { %s99_s16 = smov 128   ;;  %s100_s17 = smov 8  }
  0x11   :  { %19 = dma.hbm_to_vmem [thread:$0]  %s136_s0, 256, %s14_s7, [#allocation3], %s99_s16, %s99_s16, %s100_s17  }
  0x12   :  { %94 = dma.done.wait [#allocation3], 256  }
  0x13   :  { %95 = vsyncadd [#allocation3], 4294967040  ;;  %s101_s20 = smov [#allocation5]   ;;  %v23_v0 = vld [vmem:[#allocation2] sm:$0xff]  ;;  %v24_v1 = vld [vmem:[#allocation2 + $0x8] sm:$0xff] }
  0x14   :  { %s34_s21 = sshll.u32 %s101_s20, 4  ;;  %v25_v2 = vmax.f32 %v23_v0, 0.0  ;;  %v26_v3 = vmax.f32 %v24_v1, 0.0  ;;  %s35_s21 = int_to_ptr.vmem [resolvable:$true] %s34_s21 }
  0x15   :  { %s72_s22 = scalar_lea.vmem %s35_s21, 256  ;;  %p77_p9 = scmp.lt.s32.totalorder %s35_s21, %s35_s21 }
  0x16   :  { %27 = vst [vmem:[#allocation5] sm:$0xff] %v25_v2  ;;  %28 = vst [vmem:[#allocation5 + $0x8] sm:$0xff] %v26_v3  ;;  %p73_p8 = scmp.ne.s32.totalorder %s35_s21, %s72_s22  ;;  %p78_p10 = scmp.lt.s32.totalorder %s72_s22, %s72_s22 }
  0x18   :  { %p79_p11 = por %p78_p10, %p77_p9 }
  0x1a   :  { %p80_p12 = pnand %p79_p11, %p73_p8 }
  0x1c   :  { %83 = shalt.err (!%p80_p12)
}
  0x1d   :  { %s84_s24 = scalar_lea.hbm %s137_s1, 256 }
  0x1e   :  { %p85_p13 = scmp.ne.s32.totalorder %s137_s1, %s84_s24  ;;  %p88_p0 = scmp.lt.u32.totalorder %s84_s24, %s137_s1 }
  0x20   :  { %p90_p1 = pnand %p88_p0, %p85_p13 }
  0x22   :  { %93 = shalt.err (!%p90_p1)
}
  0x23   :  { %40 = dma.vmem_to_hbm [thread:$0]  %s35_s21, 256, %s137_s1, [#allocation4], %s99_s16, %s99_s16, %s100_s17  }
  0x24   :  { %96 = dma.done.wait [#allocation4], 256  }
  0x25   :  { %97 = vsyncadd [#allocation4], 4294967040 }
  0x26   :  { %44 = vsyncpa [#allocation3], 1 }
  0x27   :  { %45 = vsyncpa [#allocation4], 1 }

</bundles_post_ra>
